<compile_context>
chip_gen: v7x
topology: tpu7x:2x2x1
jax: 0.10.0
libtpu: 0.0.40
codegen_flags: <defaults>
</compile_context>

<pallas_src>
import functools

import jax
import jax.numpy as jnp
from jax.experimental import pallas as pl
from jax.experimental.pallas import tpu as pltpu


def _ce_label_smooth_kernel(x_ref, picked_ref, o_ref, *, epsilon, num_classes,
                            n_total, tile_n):
    """One batch tile: fused log-softmax + label-smoothed CE partial sum.

    x_ref:      (tile_n, C) logits in native dtype (bf16/f32), VMEM
    picked_ref: (tile_n, 1) f32 logits gathered at the target class
    o_ref:      (1, 8, 128) f32 lane-dense per-tile partial sum (splatted)
    """
    i = pl.program_id(0)

    x = x_ref[...]                                              # native dtype
    # Row max in native dtype (cheaper on v6e/v7x bf16; exact either way).
    m = jnp.max(x, axis=1, keepdims=True).astype(jnp.float32)   # (tile_n, 1)

    xf = x.astype(jnp.float32)
    # Streaming reductions: centering folded into the exp; no stored `z` temp.
    sum_exp = jnp.sum(jnp.exp(xf - m), axis=1, keepdims=True)   # (tile_n, 1)
    sum_x = jnp.sum(xf, axis=1, keepdims=True)                  # (tile_n, 1)
    lse = m + jnp.log(sum_exp)                                  # (tile_n, 1)

    c = jnp.float32(num_classes)
    picked = picked_ref[...]                                    # (tile_n, 1)
    # loss_r = -[(1-eps) * logp[r, t_r] + (eps/C) * sum_j logp[r, j]]
    per_row = -((1.0 - epsilon) * (picked - lse)
                + (epsilon / num_classes) * (sum_x - c * lse))  # (tile_n, 1)

    # Mask rows past the true batch: the partial last block (and any batch
    # padding) holds undefined data, so this mask is required for correctness.
    row_ids = i * tile_n + jax.lax.broadcasted_iota(jnp.int32, (tile_n, 1), 0)
    per_row = jnp.where(row_ids < n_total, per_row, 0.0)

    o_ref[...] = jnp.broadcast_to(jnp.sum(per_row), o_ref.shape)


def cross_entropy_label_smooth(inputs, targets, *, num_classes, epsilon,
                               tile_n=None):
    """inputs: (N, num_classes) float logits (any float dtype); targets: (N,) ints."""
    n, c = inputs.shape
    assert c == num_classes

    itemsize = jnp.dtype(inputs.dtype).itemsize

    # ---- tile sizing ----------------------------------------------------
    # Per-row VMEM cost: double-buffered native-dtype input blocks plus ~3
    # full-size f32 temporaries created inside the kernel (upcast, centered
    # values feeding exp, exp result).
    temp_bytes_per_elem = 3 * 4
    bytes_per_row = c * (2 * itemsize + temp_bytes_per_elem)
    vmem_budget = 40 * 1024 * 1024
    max_rows_vmem = max(8, (vmem_budget // bytes_per_row) // 8 * 8)
    # Keep each logits block around ~8 MiB for DMA efficiency (scales with C).
    rows_block = max(8, ((8 * 1024 * 1024) // (c * itemsize)) // 8 * 8)

    if tile_n is None:
        tile_n = min(max_rows_vmem, rows_block, 4096)
        # Give the grid >= 2 steps when the batch allows it (v7x has 2 TCs).
        if n >= 16:
            tile_n = min(tile_n, ((-(-n // 2)) + 7) // 8 * 8)
    tile_n = max(8, (int(tile_n) // 8) * 8)
    tile_n = min(tile_n, ((n + 7) // 8) * 8)

    num_tiles = pl.cdiv(n, tile_n)   # NOTE: no jnp.pad of the logits array

    # Hoisted target-logit gather: N elements, negligible HBM traffic, and it
    # removes the per-element iota/compare/select work from the kernel.
    picked = jnp.take_along_axis(
        inputs, targets.reshape(n, 1).astype(jnp.int32), axis=1
    ).astype(jnp.float32)                                        # (n, 1) f32

    # VMEM limit: double-buffered logits blocks + in-kernel f32 temporaries +
    # picked/out side buffers, with headroom, capped at 46 MiB so it fits
    # v7x's 64 MiB physical VMEM (v5e/v6e have 128 MiB physical).
    needed = (2 * tile_n * c * itemsize
              + temp_bytes_per_elem * tile_n * c
              + 2 * tile_n * 4
              + 2 * 8 * 128 * 4)
    vmem_limit = int(min(46 * 1024 * 1024,
                         max(32 * 1024 * 1024, needed + 4 * 1024 * 1024)))

    kernel = functools.partial(
        _ce_label_smooth_kernel,
        epsilon=float(epsilon),
        num_classes=num_classes,
        n_total=n,
        tile_n=tile_n,
    )

    partials = pl.pallas_call(
        kernel,
        out_shape=jax.ShapeDtypeStruct((num_tiles, 8, 128), jnp.float32),
        grid=(num_tiles,),
        in_specs=[
            pl.BlockSpec((tile_n, c), lambda i: (i, 0)),   # logits (native dtype)
            pl.BlockSpec((tile_n, 1), lambda i: (i, 0)),   # gathered target logits
        ],
        out_specs=pl.BlockSpec((1, 8, 128), lambda i: (i, 0, 0)),
        compiler_params=pltpu.CompilerParams(
            dimension_semantics=("parallel",),
            vmem_limit_bytes=vmem_limit,
        ),
    )(inputs, picked)

    # Final reduction over per-tile partials; divide by the GLOBAL batch size.
    return jnp.sum(partials[:, 0, 0]) / jnp.float32(n)


def _reference(inputs, targets, num_classes, epsilon):
    """Pure-JAX reference mirroring the PyTorch module exactly."""
    log_probs = jax.nn.log_softmax(inputs.astype(jnp.float32), axis=1)
    onehot = jax.nn.one_hot(targets, num_classes, dtype=jnp.float32)
    smoothed = (1.0 - epsilon) * onehot + epsilon / num_classes
    return jnp.sum(jnp.mean(-smoothed * log_probs, axis=0))


if __name__ == "__main__":
    key = jax.random.PRNGKey(0)
    epsilon = 0.1
    k1, k2, k3, k4 = jax.random.split(key, 4)

    # Test 1: small f32, single batch tile.
    batch, num_classes = 8, 32
    logits = jax.random.normal(k1, (batch, num_classes), dtype=jnp.float32)
    labels = jax.random.randint(k2, (batch,), 0, num_classes, dtype=jnp.int32)
    loss = jax.block_until_ready(cross_entropy_label_smooth(
        logits, labels, num_classes=num_classes, epsilon=epsilon))
    ref = _reference(logits, labels, num_classes, epsilon)
    assert jnp.allclose(loss, ref, rtol=1e-4, atol=1e-4), (loss, ref)

    # Test 2: multiple batch tiles + PARTIAL last block (N not a tile multiple,
    # no wrapper-side padding of the logits).
    batch2, classes2 = 20, 48
    logits2 = jax.random.normal(k3, (batch2, classes2), dtype=jnp.float32)
    labels2 = jax.random.randint(k4, (batch2,), 0, classes2, dtype=jnp.int32)
    loss2 = jax.block_until_ready(cross_entropy_label_smooth(
        logits2, labels2, num_classes=classes2, epsilon=epsilon, tile_n=8))
    ref2 = _reference(logits2, labels2, classes2, epsilon)
    assert jnp.allclose(loss2, ref2, rtol=1e-4, atol=1e-4), (loss2, ref2)

    # Test 3: native bf16 logits stay bf16 on the wire (upcast in-kernel).
    logits_bf16 = logits.astype(jnp.bfloat16)
    loss3 = jax.block_until_ready(cross_entropy_label_smooth(
        logits_bf16, labels, num_classes=num_classes, epsilon=epsilon))
    ref3 = _reference(logits_bf16, labels, num_classes, epsilon)
    assert jnp.allclose(loss3, ref3, rtol=2e-2, atol=2e-2), (loss3, ref3)

    print("KERNEL_OK")
</pallas_src>

<mosaic_0001>
module attributes {stable_mosaic.version = 11 : i64} {
  func.func @_ce_label_smooth_kernel(%arg0: i32, %arg1: memref<8x32xf32, #tpu.memory_space<vmem>>, %arg2: memref<8x1xf32, #tpu.memory_space<vmem>>, %arg3: memref<1x8x128xf32, #tpu.memory_space<vmem>>) attributes {dimension_semantics = [#tpu.dimension_semantics<parallel>], iteration_bounds = array<i64: 1>, scalar_prefetch = 0 : i64, scratch_operands = 0 : i64, tpu.core_type = #tpu.core_type<tc>, window_params = [{transform_indices = @transform_0, window_bounds = array<i64: 8, 32>}, {transform_indices = @transform_1, window_bounds = array<i64: 8, 1>}, {transform_indices = @transform_2, window_bounds = array<i64: 1, 8, 128>}]} {
    %c0 = arith.constant 0 : index
    %c0_0 = arith.constant 0 : index
    %0 = vector.load %arg1[%c0, %c0_0] : memref<8x32xf32, #tpu.memory_space<vmem>>, vector<8x32xf32>
    %cst = arith.constant dense<0xFF800000> : vector<8xf32>
    %1 = vector.multi_reduction <maximumf>, %0, %cst [1] : vector<8x32xf32> to vector<8xf32>
    %2 = vector.shape_cast %1 : vector<8xf32> to vector<8x1xf32>
    %3 = vector.broadcast %2 : vector<8x1xf32> to vector<8x32xf32>
    %4 = arith.subf %0, %3 : vector<8x32xf32>
    %5 = math.exp %4 : vector<8x32xf32>
    %cst_1 = arith.constant dense<0.000000e+00> : vector<8xf32>
    %6 = vector.multi_reduction <add>, %5, %cst_1 [1] : vector<8x32xf32> to vector<8xf32>
    %7 = vector.shape_cast %6 : vector<8xf32> to vector<8x1xf32>
    %cst_2 = arith.constant dense<0.000000e+00> : vector<8xf32>
    %8 = vector.multi_reduction <add>, %0, %cst_2 [1] : vector<8x32xf32> to vector<8xf32>
    %9 = vector.shape_cast %8 : vector<8xf32> to vector<8x1xf32>
    %10 = math.log %7 : vector<8x1xf32>
    %11 = arith.addf %2, %10 : vector<8x1xf32>
    %c0_3 = arith.constant 0 : index
    %c0_4 = arith.constant 0 : index
    %12 = vector.load %arg2[%c0_3, %c0_4] : memref<8x1xf32, #tpu.memory_space<vmem>>, vector<8x1xf32>
    %13 = arith.subf %12, %11 : vector<8x1xf32>
    %cst_5 = arith.constant 0.899999976 : f32
    %14 = vector.broadcast %cst_5 : f32 to vector<8x1xf32>
    %15 = arith.mulf %14, %13 : vector<8x1xf32>
    %cst_6 = arith.constant 3.200000e+01 : f32
    %16 = vector.broadcast %cst_6 : f32 to vector<8x1xf32>
    %17 = arith.mulf %16, %11 : vector<8x1xf32>
    %18 = arith.subf %9, %17 : vector<8x1xf32>
    %cst_7 = arith.constant 3.125000e-03 : f32
    %19 = vector.broadcast %cst_7 : f32 to vector<8x1xf32>
    %20 = arith.mulf %19, %18 : vector<8x1xf32>
    %21 = arith.addf %15, %20 : vector<8x1xf32>
    %cst_8 = arith.constant 0.000000e+00 : f32
    %22 = vector.broadcast %cst_8 : f32 to vector<8x1xf32>
    %23 = arith.subf %22, %21 : vector<8x1xf32>
    %c8_i32 = arith.constant 8 : i32
    %24 = arith.muli %arg0, %c8_i32 : i32
    %25 = tpu.iota {dimensions = array<i32: 0>} : vector<8x1xi32>
    %26 = vector.broadcast %24 : i32 to vector<8x1xi32>
    %27 = arith.addi %26, %25 : vector<8x1xi32>
    %c8_i32_9 = arith.constant 8 : i32
    %28 = vector.broadcast %c8_i32_9 : i32 to vector<8x1xi32>
    %29 = arith.cmpi slt, %27, %28 : vector<8x1xi32>
    %cst_10 = arith.constant 0.000000e+00 : f32
    %30 = vector.broadcast %cst_10 : f32 to vector<8x1xf32>
    %31 = arith.select %29, %23, %30 : vector<8x1xi1>, vector<8x1xf32>
    %32 = vector.shape_cast %31 : vector<8x1xf32> to vector<1x8x1xf32>
    %cst_11 = arith.constant dense<0.000000e+00> : vector<1xf32>
    %33 = vector.multi_reduction <add>, %32, %cst_11 [1, 2] : vector<1x8x1xf32> to vector<1xf32>
    %34 = vector.shape_cast %33 : vector<1xf32> to vector<1x1x1xf32>
    %35 = vector.extract %34[0, 0, 0] : f32 from vector<1x1x1xf32>
    %36 = vector.broadcast %35 : f32 to vector<1x8x128xf32>
    %c0_12 = arith.constant 0 : index
    %c0_13 = arith.constant 0 : index
    %c0_14 = arith.constant 0 : index
    %37 = vector.load %arg3[%c0_12, %c0_13, %c0_14] : memref<1x8x128xf32, #tpu.memory_space<vmem>>, vector<1x8x128xf32>
    tpu.vector_store %arg3[%c0_12, %c0_13, %c0_14], %36 {strides = array<i32>} : memref<1x8x128xf32, #tpu.memory_space<vmem>>, vector<1x8x128xf32>,
    return
  }
  func.func @transform_0(%arg0: i32) -> (i32, i32) {
    %c0_i32 = arith.constant 0 : i32
    %c0_i32_0 = arith.constant 0 : i32
    return %arg0, %c0_i32 : i32, i32
  }
  func.func @transform_1(%arg0: i32) -> (i32, i32) {
    %c0_i32 = arith.constant 0 : i32
    %c0_i32_0 = arith.constant 0 : i32
    return %arg0, %c0_i32 : i32, i32
  }
  func.func @transform_2(%arg0: i32) -> (i32, i32, i32) {
    %c0_i32 = arith.constant 0 : i32
    %c0_i32_0 = arith.constant 0 : i32
    %c0_i32_1 = arith.constant 0 : i32
    return %arg0, %c0_i32, %c0_i32_0 : i32, i32, i32
  }
}

</mosaic_0001>

<bundles_post_ra>
// kernel: tpu_custom_call.1
= control target key start
LH: loop header
LB: loop body
LE: loop exit
PB: predicated region body
PF: predicated region fallthrough
CT: control target
= control target key end

     0   :  { %vm13_vm0 = vcmask 261120   ;;  %s136_s0 = inlined_call_operand.vmem [shape: f32[8,32], index: 0, kind: input, shape index: {}]   ;;  %s137_s1 = inlined_call_operand.vmem [shape: f32[8,1], index: 1, kind: input, shape index: {}]   ;;  %s138_s2 = inlined_call_operand.hbm [shape: f32[1,8,128], index: 2, kind: output, shape index: {}]  }
   0x1   :  { %v12_v0 = vld [vmem:[%s136_s0] sm:$0xff] }
   0x2   :  { %7 = vsyncpa [#allocation3], 0  ;;  %v14_v1 = vsel %vm13_vm0, %v12_v0, -inf  ;;  %v23_v2 = vsel %vm13_vm0, %v12_v0, 0.0  ;;  %v29_v11 = vld [vmem:[%s137_s1] sm:$0xff]  ;;  %vm44_vm1 = vcmask 7168  }
   0x3   :  { %15 = vmax.xlane.f32.xlu0 %v14_v1  ;;  %24 = vadd.xlane.f32.xlu1 %v23_v2  ;;  %s102_s0 = smov [#allocation2]  }
   0x4   :  { %s63_s1 = sshll.u32 %s102_s0, 4  ;;  %s64_s1 = int_to_ptr.vmem [resolvable:$true] %s63_s1 }
   0x5   :  { %s78_s14 = scalar_lea.vmem %s64_s1, 128  ;;  %p83_p1 = scmp.lt.s32.totalorder %s64_s1, %s64_s1 }
   0x6   :  { %p79_p0 = scmp.ne.s32.totalorder %s64_s1, %s78_s14  ;;  %p84_p2 = scmp.lt.s32.totalorder %s78_s14, %s78_s14 }
   0x8   :  { %p85_p3 = por %p84_p2, %p83_p1 }
   0xa   :  { %p86_p4 = pnand %p85_p3, %p79_p0 }
  0x90   :  { %v16_v3 = vpop.xlane.xlu0 %15  ;;  %v25_v13 = vpop.xlane.xlu1 %24 }
  0x91   :  { %v17_v4 = vsub.f32 %v12_v0, %v16_v3 }
  0x93   :  { %v18_v5 = vmul.f32 1.442695, %v17_v4 }
  0x95   :  { %74 = vpow2.f32 %v18_v5 }
  0x9f   :  { %v75_v6 = vpop.eup %74 }
  0xa0   :  { %v20_v7 = vsel %vm13_vm0, %v75_v6, 0.0 }
  0xa1   :  { %21 = vadd.xlane.f32.xlu0 %v20_v7 }
 0x12e   :  { %v22_v8 = vpop.xlane.xlu0 %21 }
 0x12f   :  { %76 = vlog2.f32 %v22_v8 }
 0x139   :  { %v77_v9 = vpop.eup %76 }
 0x13a   :  { %v27_v10 = vmul.f32 0.6931472, %v77_v9 }
 0x13c   :  { %v28_v12 = vadd.f32 %v27_v10, %v16_v3 }
 0x13e   :  { %v32_v14 = vmul.f32 32.0, %v28_v12  ;;  %v30_v15 = vsub.f32 %v29_v11, %v28_v12 }
 0x140   :  { %v33_v16 = vsub.f32 %v25_v13, %v32_v14  ;;  %v31_v18 = vmul.f32 0.9, %v30_v15 }
 0x142   :  { %v34_v17 = vmul.f32 0.003125, %v33_v16 }
 0x144   :  { %v35_v19 = vadd.f32 %v34_v17, %v31_v18 }
 0x146   :  { %v36_v20 = vsub.f32 0.0, %v35_v19 }
 0x148   :  { %v45_v21 = vsel %vm44_vm1, %v36_v20, 0.0 }
 0x149   :  { %46 = vadd.xlane.f32.xlu1 %v45_v21 }
 0x1d6   :  { %v47_v22 = vpop.xlane.xlu1 %46 }
 0x1d7   :  { %v48_v23 = vrot.slane %v47_v22, 4 }
 0x1d9   :  { %v49_v24 = vadd.f32 %v48_v23, %v47_v22 }
 0x1db   :  { %v50_v25 = vrot.slane %v49_v24, 2 }
 0x1dd   :  { %v51_v26 = vadd.f32 %v50_v25, %v49_v24 }
 0x1df   :  { %v52_v27 = vrot.slane %v51_v26, 1 }
 0x1e1   :  { %v53_v28 = vadd.f32 %v52_v27, %v51_v26 }
 0x1e3   :  { %71 = vpush %v53_v28 }
 0x214   :  { %s72_s13 = spop %71 }
 0x215   :  { %v55_v29 = vstv %s72_s13 }
 0x216   :  { %56 = vst [vmem:[#allocation2] sm:$0xff] %v55_v29 }
 0x217   :  { %89 = shalt.err (!%p86_p4)
}
 0x218   :  { %s90_s17 = scalar_lea.hbm %s138_s2, 128 }
 0x219   :  { %p91_p5 = scmp.ne.s32.totalorder %s138_s2, %s90_s17  ;;  %p94_p6 = scmp.lt.u32.totalorder %s90_s17, %s138_s2 }
 0x21b   :  { %p96_p7 = pnand %p94_p6, %p91_p5 }
 0x21d   :  { %99 = shalt.err (!%p96_p7)
}
 0x21e   :  { %66 = dma.vmem_to_hbm [thread:$0]  %s64_s1, 128, %s138_s2, [#allocation3]  }
 0x21f   :  { %100 = dma.done.wait [#allocation3], 128  }
 0x220   :  { %101 = vsyncadd [#allocation3], 4294967168 }
 0x221   :  { %70 = vsyncpa [#allocation3], 1 }

</bundles_post_ra>
